<compile_context>
chip_gen: v7x
topology: tpu7x:2x2x1
jax: 0.10.0
libtpu: 0.0.40
codegen_flags: <defaults>
</compile_context>

<pallas_src>
import jax
import jax.numpy as jnp
from jax.experimental import pallas as pl
from jax.experimental.pallas import tpu as pltpu

_BN_EPS = 1e-5


def _choose_tile_l(L, C, itemsize, max_block_bytes):
    """Pick (TL, L_pad): TL a multiple of 128 dividing L_pad, (C, TL) tile <= budget."""
    cap = max(128, (max_block_bytes // max(C * itemsize, 1)) // 128 * 128)
    L_pad = -(-L // 128) * 128                 # round L up to a multiple of 128
    tl = min(L_pad, cap)
    while L_pad % tl:                          # largest mult-of-128 divisor of L_pad <= cap
        tl -= 128
    return tl, L_pad


def _stats_kernel(x_ref, w1_ref, b1_ref, sum_ref, sumsq_ref):
    """Per-batch partial BN stats of y = W1 @ x + b1, accumulated over length tiles."""
    t = pl.program_id(1)
    y = jnp.dot(w1_ref[...], x_ref[0], preferred_element_type=jnp.float32) + b1_ref[...]

    @pl.when(t == 0)
    def _init():
        sum_ref[...] = jnp.zeros_like(sum_ref)
        sumsq_ref[...] = jnp.zeros_like(sumsq_ref)

    sum_ref[0] += jnp.sum(y, axis=1, keepdims=True)
    sumsq_ref[0] += jnp.sum(y * y, axis=1, keepdims=True)


def _pool_kernel(x_ref, w1f_ref, b1f_ref, pool_ref):
    """Per-batch length-sum of relu(W1' @ x + b1') (BN folded into W1', b1')."""
    t = pl.program_id(1)
    yn = jnp.maximum(
        jnp.dot(w1f_ref[...], x_ref[0], preferred_element_type=jnp.float32)
        + b1f_ref[...], 0.0)

    @pl.when(t == 0)
    def _init():
        pool_ref[...] = jnp.zeros_like(pool_ref)

    pool_ref[0] += jnp.sum(yn, axis=1, keepdims=True)


def _apply_kernel(gate_ref, x_ref, out_ref):
    """out = x * gate; the (C,1) gate column for this batch arrives via BlockSpec."""
    out_ref[0] = (x_ref[0] * gate_ref[0]).astype(out_ref.dtype)


def channel_attention(x, w1, b1, gamma, beta, w2, b2, *, tile_l=None,
                      max_block_bytes=4 * 1024 * 1024,
                      vmem_limit_bytes=48 * 1024 * 1024):
    N, C, L = x.shape
    f32 = jnp.float32
    w1, b1, gamma, beta, w2, b2 = (a.astype(f32) for a in (w1, b1, gamma, beta, w2, b2))

    if tile_l is None:
        TL, L_pad = _choose_tile_l(L, C, x.dtype.itemsize, max_block_bytes)
    else:
        TL = tile_l
        L_pad = -(-L // TL) * TL
    assert TL % 128 == 0 or TL == L_pad, (TL, L_pad)
    pad = L_pad - L
    x_in = x if pad == 0 else jnp.pad(x, ((0, 0), (0, 0), (0, pad)))
    T = L_pad // TL

    mosaic_stream = pltpu.CompilerParams(
        dimension_semantics=("parallel", "arbitrary"),
        vmem_limit_bytes=vmem_limit_bytes)
    mosaic_apply = pltpu.CompilerParams(
        dimension_semantics=("parallel", "parallel"),
        vmem_limit_bytes=vmem_limit_bytes)

    x_spec = pl.BlockSpec((1, C, TL), lambda n, t: (n, 0, t))        # streaming x tiles
    mat_spec = pl.BlockSpec((C, C), lambda n, t: (0, 0))             # resident (C,C) weight
    vec_spec = pl.BlockSpec((C, 1), lambda n, t: (0, 0))             # resident (C,1) bias
    per_n_spec = pl.BlockSpec((1, C, 1), lambda n, t: (n, 0, 0))     # per-batch column

    # ---- pass A: per-batch BN statistics of y = W1 @ x + b1 ----------------------
    sum_y, sumsq_y = pl.pallas_call(
        _stats_kernel,
        out_shape=(jax.ShapeDtypeStruct((N, C, 1), f32),
                   jax.ShapeDtypeStruct((N, C, 1), f32)),
        grid=(N, T),
        in_specs=[x_spec, mat_spec, vec_spec],
        out_specs=(per_n_spec, per_n_spec),
        compiler_params=mosaic_stream,
    )(x_in, w1, b1)

    # ---- BN finalize + fold into conv weights (tiny, plain JAX) ------------------
    total_sum = jnp.sum(sum_y, axis=0)            # (C, 1)
    total_sumsq = jnp.sum(sumsq_y, axis=0)        # (C, 1)
    if pad:
        # Zero-padded x columns each contribute exactly y = b1.
        total_sum = total_sum - (N * pad) * b1
        total_sumsq = total_sumsq - (N * pad) * (b1 * b1)
    inv_nl = 1.0 / float(N * L)
    mean = total_sum * inv_nl
    var = jnp.maximum(total_sumsq * inv_nl - mean * mean, 0.0)   # biased, training-mode
    scale = gamma * jax.lax.rsqrt(var + _BN_EPS)
    shift = beta - mean * scale
    w1f = scale * w1                              # fold BN scale into conv rows
    b1f = scale * b1 + shift

    # ---- pass B: per-batch pooled sum of relu(W1' @ x + b1') ---------------------
    pooled = pl.pallas_call(
        _pool_kernel,
        out_shape=jax.ShapeDtypeStruct((N, C, 1), f32),
        grid=(N, T),
        in_specs=[x_spec, mat_spec, vec_spec],
        out_specs=per_n_spec,
        compiler_params=mosaic_stream,
    )(x_in, w1f, b1f)
    if pad:
        # Padded columns each contribute relu(b1').
        pooled = pooled - pad * jnp.maximum(b1f, 0.0)[None]

    # ---- gate conv + sigmoid (tiny, plain JAX) -----------------------------------
    g = pooled * (1.0 / float(L))                 # (N, C, 1) length-mean
    gate = jax.nn.sigmoid(jnp.einsum('oc,ncx->nox', w2, g) + b2[None])   # (N, C, 1) f32

    # ---- pass C: out = x * gate ---------------------------------------------------
    out = pl.pallas_call(
        _apply_kernel,
        out_shape=jax.ShapeDtypeStruct((N, C, L_pad), x.dtype),
        grid=(N, T),
        in_specs=[per_n_spec, x_spec],
        out_specs=x_spec,
        compiler_params=mosaic_apply,             # megacore split on both axes
    )(gate, x_in)
    if pad:
        out = out[:, :, :L]
    return out


def reference(x, w1, b1, gamma, beta, w2, b2):
    """Plain-JAX reference of the PyTorch forward (training-mode BN)."""
    y = jnp.einsum('oi,nil->nol', w1, x) + b1[None, :, :]
    mean = jnp.mean(y, axis=(0, 2), keepdims=True)
    var = jnp.mean((y - mean) ** 2, axis=(0, 2), keepdims=True)
    y = (y - mean) / jnp.sqrt(var + _BN_EPS) * gamma[None] + beta[None]
    y = jnp.maximum(y, 0.0)
    g = jnp.mean(y, axis=2, keepdims=True)
    a = jax.nn.sigmoid(jnp.einsum('oi,nil->nol', w2, g) + b2[None])
    return x * a


if __name__ == "__main__":
    key = jax.random.PRNGKey(0)
    N, C, L = 2, 16, 1024
    k_x, k_w1, k_b1, k_w2, k_b2 = jax.random.split(key, 5)

    # PyTorch-style deterministic init: Conv1d(C, C, 1) -> U(-1/sqrt(C), 1/sqrt(C));
    # BatchNorm1d -> weight=1, bias=0 (running stats unused in training-mode forward).
    bound = 1.0 / (C ** 0.5)
    x = jax.random.normal(k_x, (N, C, L), jnp.float32)
    w1 = jax.random.uniform(k_w1, (C, C), jnp.float32, -bound, bound)
    b1 = jax.random.uniform(k_b1, (C, 1), jnp.float32, -bound, bound)
    gamma = jnp.ones((C, 1), jnp.float32)
    beta = jnp.zeros((C, 1), jnp.float32)
    w2 = jax.random.uniform(k_w2, (C, C), jnp.float32, -bound, bound)
    b2 = jax.random.uniform(k_b2, (C, 1), jnp.float32, -bound, bound)

    # tile_l=256 -> 4 length tiles per batch, exercising the tiled accumulation paths.
    out = channel_attention(x, w1, b1, gamma, beta, w2, b2, tile_l=256)
    jax.block_until_ready(out)

    ref = reference(x, w1, b1, gamma, beta, w2, b2)
    max_err = float(jnp.max(jnp.abs(out - ref)))
    assert out.shape == (N, C, L)
    assert max_err < 2e-4, f"max_err={max_err}"
    print("KERNEL_OK")
</pallas_src>

<mosaic_0001>
module attributes {stable_mosaic.version = 11 : i64} {
  func.func @_stats_kernel(%arg0: i32, %arg1: i32, %arg2: memref<1x16x256xf32, #tpu.memory_space<vmem>>, %arg3: memref<16x16xf32, #tpu.memory_space<vmem>>, %arg4: memref<16x1xf32, #tpu.memory_space<vmem>>, %arg5: memref<1x16x1xf32, #tpu.memory_space<vmem>>, %arg6: memref<1x16x1xf32, #tpu.memory_space<vmem>>) attributes {dimension_semantics = [#tpu.dimension_semantics<parallel>, #tpu.dimension_semantics<arbitrary>], iteration_bounds = array<i64: 2, 4>, scalar_prefetch = 0 : i64, scratch_operands = 0 : i64, tpu.core_type = #tpu.core_type<tc>, window_params = [{transform_indices = @transform_0, window_bounds = array<i64: 1, 16, 256>}, {pipeline_mode = #tpu.pipeline_mode<synchronous>, transform_indices = @transform_1, window_bounds = array<i64: 16, 16>}, {pipeline_mode = #tpu.pipeline_mode<synchronous>, transform_indices = @transform_2, window_bounds = array<i64: 16, 1>}, {transform_indices = @transform_3, window_bounds = array<i64: 1, 16, 1>}, {transform_indices = @transform_4, window_bounds = array<i64: 1, 16, 1>}]} {
    %c0 = arith.constant 0 : index
    %c0_0 = arith.constant 0 : index
    %0 = vector.load %arg3[%c0, %c0_0] : memref<16x16xf32, #tpu.memory_space<vmem>>, vector<16x16xf32>
    %c0_1 = arith.constant 0 : index
    %c0_2 = arith.constant 0 : index
    %c0_3 = arith.constant 0 : index
    %1 = vector.load %arg2[%c0_1, %c0_2, %c0_3] : memref<1x16x256xf32, #tpu.memory_space<vmem>>, vector<1x16x256xf32>
    %2 = vector.shape_cast %1 : vector<1x16x256xf32> to vector<16x256xf32>
    %cst = arith.constant dense<0.000000e+00> : vector<16x256xf32>
    %3 = tpu.matmul %0, %2, %cst {dimension_numbers = #tpu.dot_dimension_numbers<[1], [0], [0], [1], [0, 0, 1, 1], [], []>} : vector<16x16xf32>, vector<16x256xf32>, vector<16x256xf32> -> vector<16x256xf32>
    %c0_4 = arith.constant 0 : index
    %c0_5 = arith.constant 0 : index
    %4 = vector.load %arg4[%c0_4, %c0_5] : memref<16x1xf32, #tpu.memory_space<vmem>>, vector<16x1xf32>
    %5 = vector.broadcast %4 : vector<16x1xf32> to vector<16x256xf32>
    %6 = arith.addf %3, %5 : vector<16x256xf32>
    %c0_i32 = arith.constant 0 : i32
    %7 = arith.cmpi eq, %arg1, %c0_i32 : i32
    %8 = arith.extui %7 : i1 to i32
    %c0_i32_6 = arith.constant 0 : i32
    %9 = arith.cmpi ne, %8, %c0_i32_6 : i32
    scf.if %9 {
      %cst_21 = arith.constant 0.000000e+00 : f32
      %27 = vector.broadcast %cst_21 : f32 to vector<1x16x1xf32>
      %c0_22 = arith.constant 0 : index
      %c0_23 = arith.constant 0 : index
      %c0_24 = arith.constant 0 : index
      %28 = vector.load %arg5[%c0_22, %c0_23, %c0_24] : memref<1x16x1xf32, #tpu.memory_space<vmem>>, vector<1x16x1xf32>
      tpu.vector_store %arg5[%c0_22, %c0_23, %c0_24], %27 {strides = array<i32>} : memref<1x16x1xf32, #tpu.memory_space<vmem>>, vector<1x16x1xf32>,
      %cst_25 = arith.constant 0.000000e+00 : f32
      %29 = vector.broadcast %cst_25 : f32 to vector<1x16x1xf32>
      %c0_26 = arith.constant 0 : index
      %c0_27 = arith.constant 0 : index
      %c0_28 = arith.constant 0 : index
      %30 = vector.load %arg6[%c0_26, %c0_27, %c0_28] : memref<1x16x1xf32, #tpu.memory_space<vmem>>, vector<1x16x1xf32>
      tpu.vector_store %arg6[%c0_26, %c0_27, %c0_28], %29 {strides = array<i32>} : memref<1x16x1xf32, #tpu.memory_space<vmem>>, vector<1x16x1xf32>,
    } else {
    }
    %c0_7 = arith.constant 0 : index
    %c0_8 = arith.constant 0 : index
    %c0_9 = arith.constant 0 : index
    %10 = vector.load %arg5[%c0_7, %c0_8, %c0_9] : memref<1x16x1xf32, #tpu.memory_space<vmem>>, vector<1x16x1xf32>
    %11 = vector.shape_cast %10 : vector<1x16x1xf32> to vector<16x1xf32>
    %cst_10 = arith.constant dense<0.000000e+00> : vector<16xf32>
    %12 = vector.multi_reduction <add>, %6, %cst_10 [1] : vector<16x256xf32> to vector<16xf32>
    %13 = vector.shape_cast %12 : vector<16xf32> to vector<16x1xf32>
    %14 = arith.addf %11, %13 : vector<16x1xf32>
    %c0_11 = arith.constant 0 : index
    %c0_12 = arith.constant 0 : index
    %c0_13 = arith.constant 0 : index
    %15 = vector.load %arg5[%c0_11, %c0_12, %c0_13] : memref<1x16x1xf32, #tpu.memory_space<vmem>>, vector<1x16x1xf32>
    %16 = vector.shape_cast %15 : vector<1x16x1xf32> to vector<16x1xf32>
    %17 = vector.shape_cast %14 : vector<16x1xf32> to vector<1x16x1xf32>
    tpu.vector_store %arg5[%c0_11, %c0_12, %c0_13], %17 {strides = array<i32>} : memref<1x16x1xf32, #tpu.memory_space<vmem>>, vector<1x16x1xf32>,
    %c0_14 = arith.constant 0 : index
    %c0_15 = arith.constant 0 : index
    %c0_16 = arith.constant 0 : index
    %18 = vector.load %arg6[%c0_14, %c0_15, %c0_16] : memref<1x16x1xf32, #tpu.memory_space<vmem>>, vector<1x16x1xf32>
    %19 = vector.shape_cast %18 : vector<1x16x1xf32> to vector<16x1xf32>
    %20 = arith.mulf %6, %6 : vector<16x256xf32>
    %cst_17 = arith.constant dense<0.000000e+00> : vector<16xf32>
    %21 = vector.multi_reduction <add>, %20, %cst_17 [1] : vector<16x256xf32> to vector<16xf32>
    %22 = vector.shape_cast %21 : vector<16xf32> to vector<16x1xf32>
    %23 = arith.addf %19, %22 : vector<16x1xf32>
    %c0_18 = arith.constant 0 : index
    %c0_19 = arith.constant 0 : index
    %c0_20 = arith.constant 0 : index
    %24 = vector.load %arg6[%c0_18, %c0_19, %c0_20] : memref<1x16x1xf32, #tpu.memory_space<vmem>>, vector<1x16x1xf32>
    %25 = vector.shape_cast %24 : vector<1x16x1xf32> to vector<16x1xf32>
    %26 = vector.shape_cast %23 : vector<16x1xf32> to vector<1x16x1xf32>
    tpu.vector_store %arg6[%c0_18, %c0_19, %c0_20], %26 {strides = array<i32>} : memref<1x16x1xf32, #tpu.memory_space<vmem>>, vector<1x16x1xf32>,
    return
  }
  func.func @transform_0(%arg0: i32, %arg1: i32) -> (i32, i32, i32) {
    %c0_i32 = arith.constant 0 : i32
    %c0_i32_0 = arith.constant 0 : i32
    return %arg0, %c0_i32, %arg1 : i32, i32, i32
  }
  func.func @transform_1(%arg0: i32, %arg1: i32) -> (i32, i32) {
    %c0_i32 = arith.constant 0 : i32
    %c0_i32_0 = arith.constant 0 : i32
    %c0_i32_1 = arith.constant 0 : i32
    return %c0_i32, %c0_i32_0 : i32, i32
  }
  func.func @transform_2(%arg0: i32, %arg1: i32) -> (i32, i32) {
    %c0_i32 = arith.constant 0 : i32
    %c0_i32_0 = arith.constant 0 : i32
    %c0_i32_1 = arith.constant 0 : i32
    return %c0_i32, %c0_i32_0 : i32, i32
  }
  func.func @transform_3(%arg0: i32, %arg1: i32) -> (i32, i32, i32) {
    %c0_i32 = arith.constant 0 : i32
    %c0_i32_0 = arith.constant 0 : i32
    %c0_i32_1 = arith.constant 0 : i32
    return %arg0, %c0_i32, %c0_i32_0 : i32, i32, i32
  }
  func.func @transform_4(%arg0: i32, %arg1: i32) -> (i32, i32, i32) {
    %c0_i32 = arith.constant 0 : i32
    %c0_i32_0 = arith.constant 0 : i32
    %c0_i32_1 = arith.constant 0 : i32
    return %arg0, %c0_i32, %c0_i32_0 : i32, i32, i32
  }
}

</mosaic_0001>

<bundles_post_ra>
// kernel: tpu_custom_call.1
= control target key start
LH: loop header
LB: loop body
LE: loop exit
PB: predicated region body
PF: predicated region fallthrough
CT: control target
= control target key end

     0   :  { %10 = vsyncpa [#allocation3], 0  ;;  %s918_s0 = inlined_call_operand.hbm [shape: f32[2,16,1024], index: 0, kind: input, shape index: {}]   ;;  %s919_s1 = inlined_call_operand.vmem [shape: f32[16,16], index: 1, kind: input, shape index: {}]   ;;  %s920_s2 = inlined_call_operand.vmem [shape: f32[16,1], index: 2, kind: input, shape index: {}]   ;;  %s921_s3 = inlined_call_operand.vmem [shape: f32[2,16,1], index: 3, kind: output, shape index: {0}]   ;;  %s922_s4 = inlined_call_operand.vmem [shape: f32[2,16,1], index: 4, kind: output, shape index: {1}]  }
   0x1   :  { %12 = vsyncpa [#allocation3 + $0x1], 0  ;;  %s737_s15 = smov 0   ;;  %s739_s16 = smov 0  }
   0x2   :  { %s741_s17 = smov 0   ;;  %s743_s18 = smov 0  }
   0x3   :  { %s745_s19 = smov 0   ;;  %s747_s20 = smov 0  }
   0x4   :  { %s749_s21 = smov 0   ;;  %s751_s22 = smov 0  }
   0x5 LB: > { %s502_s23 = sadd.s32 4294967295, %s703_s22   ;;  %s27_s24 = sadd.s32 1, %s695_s20  ;;  %s703_s22 = sphi %s751_s22, %s18_s22   ;;  %s699_s21 = sphi %s749_s21, %s935_s21   ;;  %s695_s20 = sphi %s747_s20, %s934_s20   ;;  %s691_s19 = sphi %s745_s19, %s933_s19   ;;  %s687_s18 = sphi %s743_s18, %s932_s18   ;;  %s683_s17 = sphi %s741_s17, %s931_s17   ;;  %s679_s16 = sphi %s739_s16, %s930_s16   ;;  %s675_s15 = sphi %s737_s15, %s929_s15  }
   0x6   : > { %p28_p0 = scmp.ge.s32.totalorder %s27_s24, 4  ;;  %s30_s25 = sadd.s32 1, %s699_s21 }
   0x7   : > { %s39_s26 = sadd.s32 1, %s683_s17  ;;  %p46_p1 = scmp.ne.s32.totalorder %s683_s17, %s679_s16 }
   0x8   : > { %s937_s24 = smov (%p28_p0, %s27_s24), 0  ;;  %s939_s25 = smov (!%p28_p0, %s30_s25), %s699_s21 }
   0x9   : > { %924 = sst [smem:[#allocation5_spill]] %s937_s24  ;;  %s35_s27 = ssub.s32 %s695_s20, %s937_s24 }
   0xa   : > { %p47_p2 = scmp.eq.s32.totalorder %s703_s22, 0  ;;  %p32_p3 = scmp.ge.s32.totalorder %s939_s25, 2 }
   0xb   : > { %p52_p4 = scmp.ne.s32.totalorder %s679_s16, %s675_s15  ;;  %p53_p6 = scmp.eq.s32.totalorder %s502_s23, 0 }
   0xc   : > { %p788_p5 = por %p47_p2, %p46_p1  ;;  %s941_s25 = smov (%p32_p3, %s939_s25), 0 }
   0xd   : > { %p794_p7 = por %p53_p6, %p52_p4  ;;  %s34_s30 = ssub.s32 %s699_s21, %s941_s25 }
   0xe   : > { %p535_p8 = scmp.lt.s32.totalorder %s703_s22, 8  ;;  %s36_s5 = sor.u32 %s35_s27, %s34_s30 }
   0xf   : > { %s176_s6 = sand.u32 1, %s683_s17   ;;  %p37_p9 = scmp.eq.s32.totalorder %s36_s5, 0 }
  0x10   : > { %s506_s7 = sshll.u32 %s176_s6, 5  ;;  %s507_s8 = sshll.u32 %s695_s20, 1 }
  0x11   : > { %s804_s9 = scalar_select %p37_p9, %s683_s17, %s39_s26  }
  0x12   : > { %s508_s10 = sshll.u32 %s699_s21, 4  ;;  %s180_s12 = scalar_lea.vmem [#allocation2], %s506_s7 }
  0x13   : > { %s186_s11 = sadd.s32 %s508_s10, %s507_s8  ;;  %s189_s13 = sshll.u32 %s180_s12, 4  ;;  %s807_s13 = int_to_ptr.vmem [resolvable:$true] %s189_s13 }
  0x14   : > { %s509_s14 = sshll.u32 %s186_s11, 7  ;;  %p818_p10 = pnand %p535_p8, %p788_p5 }
  0x15   : > { %s812_s24 = scalar_lea.hbm %s918_s0, %s509_s14  ;;  %s822_s27 = scalar_lea.sflag [#allocation3], %s176_s6 }
  0x16   : > { %s607_s30 = scalar_lea.hbm %s812_s24, 512  ;;  %p609_p12 = pneg %p818_p10 }
  0x17   : > { %p608_p11 = scmp.ne.s32.totalorder %s812_s24, %s607_s30  ;;  %s612_s7 = scalar_lea.hbm %s918_s0, 4096 }
  0x18   : > { %p613_p1 = scmp.lt.u32.totalorder %s812_s24, %s918_s0  ;;  %p614_p2 = scmp.lt.u32.totalorder %s612_s7, %s607_s30 }
  0x19   : > { %p610_p13 = pnand %p609_p12, %p608_p11  ;;  %p616_p4 = scmp.lt.u32.totalorder %s607_s30, %s812_s24 }
  0x1a   : > { %p615_p3 = por %p614_p2, %p613_p1 }
  0x1b   : > { %p611_p0 = pneg %p610_p13 }
  0x1c   : > { %p617_p5 = por %p616_p4, %p615_p3 }
  0x1e   : > { %p618_p6 = pnand %p617_p5, %p611_p0 }
  0x20   : > { %621 = shalt.err (!%p618_p6)
}
  0x21   : > { %s622_s6 = scalar_lea.vmem %s807_s13, 512  ;;  %s705_s11 = smov [#allocation2]  }
  0x22   : > { %p623_p8 = scmp.ne.s32.totalorder %s807_s13, %s622_s6  ;;  %s627_s12 = sshll.u32 %s705_s11, 4  ;;  %s628_s12 = int_to_ptr.vmem [resolvable:$false] %s627_s12 }
  0x23   : > { %s629_s14 = scalar_lea.vmem %s628_s12, 1024  ;;  %p630_p13 = scmp.lt.s32.totalorder %s807_s13, %s628_s12 }
  0x24   : > { %p625_p9 = pnand %p623_p8, %p609_p12  ;;  %p631_p1 = scmp.lt.s32.totalorder %s629_s14, %s622_s6 }
  0x26   : > { %p626_p11 = pneg %p625_p9  ;;  %p632_p2 = por %p631_p1, %p630_p13 }
  0x28   : > { %p633_p3 = pnand %p632_p2, %p626_p11 }
  0x2a   : > { %636 = shalt.err (!%p633_p3)
}
  0x2b   : > { %s706_s15 = smov 1024   ;;  %s707_s23 = smov 256  }
  0x2c   : > { %s708_s30 = smov 16   ;;  %p510_p12 = scmp.ge.s32.totalorder %s703_s22, 1 }
  0x2d   : > { %534 = dma.hbm_to_vmem [thread:$0]  (!%p818_p10), %s812_s24, 512, %s807_s13, %s822_s27, %s706_s15, %s707_s23, %s708_s30  }
  0x2e   : > { %p197_p0 = scmp.lt.s32.totalorder %s703_s22, 9 }
  0x30   : > { %p198_p4 = pnand %p510_p12, %p197_p0 }
  0x31   : > { %s203_s28 = sand.u32 (!%p198_p4), 1, %s679_s16  }
  0x32   : > { %201 = sbr.rel (%p198_p4) target bundleno = 433 (0x1b1), region = 32  ;;  %s511_s5 = sshll.u32 (!%p198_p4), %s203_s28, 5 }
  0x33   : > { %s204_s7 = scalar_lea.sflag (!%p198_p4), [#allocation3], %s203_s28  ;;  %s207_s8 = scalar_lea.vmem (!%p198_p4), [#allocation2], %s511_s5 }
  0x39   : > { %670 = dma.done.wait (%p794_p7), %s204_s7, 512  }
  0x3a   : > { %672 = vsyncadd (%p794_p7), %s204_s7, 4294966784  ;;  %p238_p5 = scmp.lt.s32.totalorder %s691_s19, 1  ;;  %v709_v0 = vmov 0.0   ;;  %v710_v1 = vmov 0   ;;  %v251_v2 = vld [vmem:[%s207_s8 + $0x8] sm:$0xff]  ;;  %v253_v3 = vld [vmem:[%s207_s8 + $0x18] sm:$0xff] }
  0x3b   : > { %337 = vmatprep.mubr.f32.mxu0 %v709_v0  ;;  %343 = vmatprep.mubr.f32.mxu1 %v709_v0  ;;  %v250_v4 = vld [vmem:[%s207_s8] sm:$0xff]  ;;  %v523_v5 = vpack.c.bf16 %v253_v3, %v251_v2  ;;  %v252_v6 = vld [vmem:[%s207_s8 + $0x10] sm:$0xff]  ;;  %vm266_vm0 = vcmask 130048   ;;  %v249_v10 = vld [vmem:[%s919_s1 + $0x8] sm:$0xff]  ;;  %p518_p7 = scmp.ne.s32.totalorder %s687_s18, 0 }
  0x3c   : > { %s943_s19 = smov (!%p238_p5, %s691_s19), 1  ;;  %606 = vset.pattern.permute.xlu0 %v710_v1  ;;  %v525_v7 = vpack.c.bf16 %v252_v6, %v250_v4  ;;  %v254_v8 = vld [vmem:[%s920_s2] sm:$0xff]  ;;  %v255_v11 = vld [vmem:[%s920_s2 + $0x8] sm:$0xff]  ;;  %vm354_vm1 = vcmask (!%p518_p7), 7168   ;;  %v711_v22 = vmov (!%p518_p7), 0.0  }
  0x3d   : > { %s521_s24 = sshll.u32 %s943_s19, 4  ;;  %524 = vmatprep.subr.bf16.mxu0 %v523_v5  ;;  %527 = vmatprep.subr.bf16.mxu1 %v523_v5  ;;  %v248_v9 = vld [vmem:[%s919_s1] sm:$0xff] }
  0x3e   : > { %s862_s27 = scalar_lea.vmem %s921_s3, %s521_s24  ;;  %s867_s29 = scalar_lea.vmem %s922_s4, %s521_s24  ;;  %526 = vmatpush1.bf16.msra.mxu0 %v525_v7  ;;  %528 = vmatpush1.bf16.msra.mxu1 %v525_v7 }
  0x3f   : > { %258 = vperm.xlu0 %606, %v254_v8   ;;  %355 = vst.msk [vmem:[%s862_s27] sm:$0xff] (!%p518_p7), %vm354_vm1, %v711_v22  ;;  %356 = vst.msk [vmem:[%s862_s27 + $0x8] sm:$0xff] (!%p518_p7), %vm354_vm1, %v711_v22 }
  0x40   : > { %357 = vst.msk [vmem:[%s867_s29] sm:$0xff] (!%p518_p7), %vm354_vm1, %v711_v22  ;;  %358 = vst.msk [vmem:[%s867_s29 + $0x8] sm:$0xff] (!%p518_p7), %vm354_vm1, %v711_v22 }
  0x41   : > { %516 = vmatmul.mubr.msk.f32.vlgmr.msra.gmra.mrb[0].mxu0 %vm266_vm0, %v248_v9  ;;  %517 = vmatmul.mubr.msk.f32.vlgmr.msra.gmra.mrb[0].mxu1 %vm266_vm0, %v249_v10 }
  0x43   : > { %263 = vperm.xlu0 %606, %v255_v11  }
  0xbe   : > { %v259_v12 = vpop.permute.xlu0 %258 }
  0xc2   : > { %v264_v13 = vpop.permute.xlu0 %263 }
 0x110   : > { %353 = sbr.rel (%p518_p7) target bundleno = 279 (0x117), region = 40 }
 0x114   : > { %v339_v14 = vpop.f32.mrb[0].mxu0  ;;  %v345_v15 = vpop.f32.mrb[0].mxu1 }
 0x115   : > { %v340_v16 = vadd.f32 %v339_v14, %v259_v12  ;;  %v346_v17 = vadd.f32 %v345_v15, %v264_v13  ;;  %v341_v18 = vpop.f32.mrb[1].mxu0  ;;  %v347_v19 = vpop.f32.mrb[1].mxu1 }
 0x116   : > { %v342_v20 = vadd.f32 %v341_v18, %v259_v12  ;;  %v348_v21 = vadd.f32 %v347_v19, %v264_v13 }
 0x117 PF: > { %v374_v23 = vmul.f32 %v340_v16, %v340_v16  ;;  %v376_v26 = vmul.f32 %v346_v17, %v346_v17  ;;  %v359_v31 = vld [vmem:[%s862_s27] sm:$0xff]  ;;  %vm369_vm2 = vcmask 7168   ;;  %v360_v36 = vld [vmem:[%s862_s27 + $0x8] sm:$0xff] }
 0x118   : > { %v375_v24 = vmul.f32 %v342_v20, %v342_v20  ;;  %v361_v25 = vadd.f32 %v342_v20, %v340_v16  ;;  %v377_v27 = vmul.f32 %v348_v21, %v348_v21  ;;  %v364_v29 = vadd.f32 %v348_v21, %v346_v17  ;;  %v372_v32 = vld [vmem:[%s867_s29] sm:$0xff]  ;;  %v373_v38 = vld [vmem:[%s867_s29 + $0x8] sm:$0xff] }
 0x11a   : > { %v378_v28 = vadd.f32 %v375_v24, %v374_v23  ;;  %362 = vadd.xlane.f32.xlu0 %v361_v25  ;;  %v381_v30 = vadd.f32 %v377_v27, %v376_v26 }
 0x11c   : > { %379 = vadd.xlane.f32.xlu1 %v378_v28 }
 0x11e   : > { %365 = vadd.xlane.f32.xlu0 %v364_v29 }
 0x120   : > { %382 = vadd.xlane.f32.xlu1 %v381_v30 }
 0x1a7   : > { %v363_v33 = vpop.xlane.xlu0 %362 }
 0x1a8   : > { %v367_v34 = vadd.f32 %v363_v33, %v359_v31 }
 0x1a9   : > { %v380_v35 = vpop.xlane.xlu1 %379 }
 0x1aa   : > { %v384_v37 = vadd.f32 %v380_v35, %v372_v32  ;;  %370 = vst.msk [vmem:[%s862_s27] sm:$0xff] %vm369_vm2, %v367_v34 }
 0x1ab   : > { %v366_v39 = vpop.xlane.xlu0 %365 }
 0x1ac   : > { %386 = vst.msk [vmem:[%s867_s29] sm:$0xff] %vm369_vm2, %v384_v37  ;;  %v368_v40 = vadd.f32 %v366_v39, %v360_v36 }
 0x1ad   : > { %v383_v41 = vpop.xlane.xlu1 %382 }
 0x1ae   : > { %v385_v42 = vadd.f32 %v383_v41, %v373_v38  ;;  %371 = vst.msk [vmem:[%s862_s27 + $0x8] sm:$0xff] %vm369_vm2, %v368_v40 }
 0x1b0   : > { %387 = vst.msk [vmem:[%s867_s29 + $0x8] sm:$0xff] %vm369_vm2, %v385_v42 }
 0x1b1 PF: > { %s18_s22 = sadd.s32 1, %s703_s22   ;;  %s928_s5 = sld [smem:[#allocation5_spill]] }
 0x1b2   : > { %p15_p10 = scmp.ge.s32.totalorder %s18_s22, 10   ;;  %s929_s15 = smov %s679_s16 }
 0x1b3   : > { %s930_s16 = smov %s683_s17  ;;  %s931_s17 = smov %s804_s9 }
 0x1b4   : > { %s932_s18 = smov %s695_s20  ;;  %s933_s19 = smov %s699_s21 }
 0x1b5   : > { %s935_s21 = smov %s941_s25  ;;  %17 = sbr.rel (!%p15_p10) target bundleno = 5 (0x5), region = 88 }
 0x1b7   : > { %s934_s20 = smov %s928_s5 }
 0x1bc   :  { %425 = vsyncpa [#allocation3], 1 }
 0x1bd   :  { %427 = vsyncpa [#allocation3 + $0x1], 1 }

</bundles_post_ra>
